<compile_context>
chip_gen: v6e
topology: v6e:2x2x1
jax: 0.10.0
libtpu: 0.0.40
codegen_flags: <defaults>
</compile_context>

<pallas_src>
import jax
import jax.numpy as jnp
from jax import lax
from jax.experimental import pallas as pl
from jax.experimental.pallas import tpu as pltpu

LAM = 0.2


def _barlow_twins_kernel(x_ref, y_ref, gram_ref):
    """One F-chunk: standardize columns, accumulate the (2N, 2N) Gram matrix.

    `gram_ref` is the (1, 2N, 2N) output block of this split; its block index
    ignores the trailing (reduction) grid axis, so it stays resident in VMEM
    and acts as the accumulator.
    """
    k = pl.program_id(1)

    @pl.when(k == 0)
    def _():
        gram_ref[...] = jnp.zeros_like(gram_ref)

    x = x_ref[...].astype(jnp.float32)          # [N, TF]
    y = y_ref[...].astype(jnp.float32)          # [N, TF]
    n = x.shape[0]

    # Column reductions as (N, N)-ones matmuls: keeps the hot loop off the
    # VPU/XLU sublane-reduce path and on the otherwise idle MXU (biggest win
    # on v7x, margin-saver on v6e).  Normalizers are folded into the constants.
    mean_mat = jnp.full((n, n), 1.0 / n, dtype=jnp.float32)
    var_mat = jnp.full((n, n), 1.0 / max(n - 1, 1), dtype=jnp.float32)   # ddof=1

    def standardize(a):
        # Two-pass (centered) statistics: avoids the catastrophic cancellation
        # of the one-pass sum-of-squares formula for non-zero-mean features.
        mean = lax.dot_general(mean_mat, a, (((1,), (0,)), ((), ())),
                               preferred_element_type=jnp.float32)        # [N, TF]
        c = a - mean
        var = lax.dot_general(var_mat, c * c, (((1,), (0,)), ((), ())),
                              preferred_element_type=jnp.float32)         # [N, TF]
        # A constant feature column gives var == 0 -> rsqrt = inf -> 0*inf = NaN,
        # matching the torch reference's divide-by-zero propagation.
        return c * lax.rsqrt(var)

    z = jnp.concatenate([standardize(x), standardize(y)], axis=0)         # [2N, TF]

    # Single Gram matmul per step: off-diagonal N x N block = correlation
    # numerator, diagonal holds |xs_i|^2 and |ys_j|^2.
    gram = lax.dot_general(z, z, (((1,), (1,)), ((), ())),
                           preferred_element_type=jnp.float32)            # [2N, 2N]
    gram_ref[...] += gram[None, :, :]


def _pick_feature_tile(n, f, itemsize):
    """F-chunk width + matching compiler VMEM limit from a generation-aware budget.

    Live-VMEM model per grid step (bytes):
      * input stream : 2 arrays x 2 pipeline buffers x N x TF x itemsize
      * f32 temps    : ~8 x N x TF x 4  (casts, mean/var, centered, stacked Z)
    The (2N, 2N) accumulator and stats constants are negligible.  Targets
    multi-MiB per-step DMAs (kernel is HBM-bound) while respecting v7x's
    64 MiB / TensorCore vs 128 MiB on v5e/v6e.
    """
    try:
        info = pltpu.get_tpu_info()
        phys = int(getattr(info, "vmem_capacity_bytes", 0)) or (64 << 20)
    except Exception:                 # no TPU info: assume the smallest (v7x) VMEM
        phys = 64 << 20

    budget = min(int(phys * 0.55), 48 << 20)                 # live bytes per step
    vmem_limit = max(min(int(phys * 0.75), 96 << 20), 32 << 20)

    def live_bytes(tf):
        return n * tf * (4 * itemsize + 32)

    if f % 128 != 0:
        # Full-width block (BlockSpec full-dim exception).
        # TODO(synk): pad + mask a ragged F tail instead, if a non-lane-aligned
        # F ever becomes large enough to pressure VMEM.
        return f, vmem_limit

    best = 128
    tf = 128
    while tf <= f:
        if f % tf == 0 and live_bytes(tf) <= budget:
            best = tf
        tf += 128
    return best, vmem_limit


def barlow_twins_loss(x1, x2, lam=LAM, *, feature_tile=None):
    """x1, x2: [N, C, H, W] (or any [N, ...]). Returns the scalar f32 loss."""
    n = x1.shape[0]
    # Stream in native dtype (no f32 copy in HBM); cast after the DMA in-kernel.
    x1f = x1.reshape(n, -1)
    x2f = x2.reshape(n, -1)
    f = x1f.shape[1]
    assert x2f.shape == (n, f), "x1 and x2 must flatten to the same [N, F]"

    tf_auto, vmem_limit = _pick_feature_tile(n, f, x1f.dtype.itemsize)
    tf = tf_auto if feature_tile is None else feature_tile
    assert f % tf == 0 and (tf == f or tf % 128 == 0), (f, tf)

    n_chunks = f // tf
    # Shard the F reduction across both TensorCores on multi-core chips (v7x);
    # runs sequentially (and harmlessly) on single-core v5e/v6e.
    splits = 2 if (n_chunks >= 2 and n_chunks % 2 == 0) else 1
    chunks_per_split = n_chunks // splits

    itemsize = x1f.dtype.itemsize
    cost = pl.CostEstimate(
        flops=16 * n * n * f + 10 * n * f,          # stats matmuls + Gram + elementwise
        transcendentals=2 * f,                      # rsqrt per column, x and y
        bytes_accessed=2 * n * f * itemsize + splits * (2 * n) * (2 * n) * 4,
    )

    partial = pl.pallas_call(
        _barlow_twins_kernel,
        out_shape=jax.ShapeDtypeStruct((splits, 2 * n, 2 * n), jnp.float32),
        grid_spec=pltpu.PrefetchScalarGridSpec(
            num_scalar_prefetch=0,
            grid=(splits, chunks_per_split),
            in_specs=[
                # TODO(synk): for bf16 inputs, stacking x/y into one (2N, TF)
                # HBM operand would restore dense (16, 128) sublane packing,
                # but the wrapper-side concat costs an extra HBM round trip,
                # so the two streams stay separate.
                pl.BlockSpec((n, tf), lambda c, k: (0, c * chunks_per_split + k)),
                pl.BlockSpec((n, tf), lambda c, k: (0, c * chunks_per_split + k)),
            ],
            out_specs=pl.BlockSpec((1, 2 * n, 2 * n), lambda c, k: (c, 0, 0)),
        ),
        compiler_params=pltpu.CompilerParams(
            dimension_semantics=("parallel", "arbitrary"),
            vmem_limit_bytes=vmem_limit,
        ),
        cost_estimate=cost,
    )(x1f, x2f)

    # Tiny O(N^2) finalize on the summed Gram partials (plain JAX, fused by XLA).
    g = jnp.sum(partial, axis=0)                                 # (2N, 2N)
    norms2 = jnp.diagonal(g)                                     # |xs_i|^2 ; |ys_j|^2
    num = g[:n, n:]                                              # xs @ ys.T
    c_mat = num * lax.rsqrt(norms2[:n])[:, None] * lax.rsqrt(norms2[n:])[None, :]
    diag_c = jnp.diagonal(c_mat)
    inv_term = n - jnp.sum(diag_c)                               # sum(diag(1 - C))
    red_term = jnp.sum(c_mat * c_mat) - jnp.sum(diag_c * diag_c) # off-diag sum(C^2)
    return (inv_term + lam * red_term) / n


def _reference(x1, x2, lam=LAM):
    """Pure-JAX reference mirroring the PyTorch module (fresh-state path)."""
    n = x1.shape[0]
    x = x1.reshape(n, -1).astype(jnp.float32)
    y = x2.reshape(n, -1).astype(jnp.float32)

    def standardize(a):
        mean = jnp.mean(a, axis=0, keepdims=True)
        std = jnp.std(a, axis=0, keepdims=True, ddof=1)
        return (a - mean) / std

    xs, ys = standardize(x), standardize(y)
    num = xs @ ys.T
    d = jnp.linalg.norm(xs, axis=-1)[:, None] * jnp.linalg.norm(ys, axis=-1)[None, :]
    C = num / d
    inv_term = jnp.sum(jnp.diagonal(1.0 - C))
    red = C ** 2
    red = red - jnp.diag(jnp.diagonal(red))
    return inv_term / n + jnp.sum(red) / n * lam


if __name__ == "__main__":
    key = jax.random.PRNGKey(0)
    k1, k2 = jax.random.split(key)
    # batch=8, channels=4, spatial=16 -> flattened features F = 1024.
    # x2 is shifted/scaled so the two-pass (centered) statistics path is exercised.
    x1 = jax.random.normal(k1, (8, 4, 16, 16), dtype=jnp.float32)
    x2 = 0.5 * jax.random.normal(k2, (8, 4, 16, 16), dtype=jnp.float32) + 0.3

    ref = jax.block_until_ready(_reference(x1, x2))

    # Default path: tile sized from the VMEM budget (single F chunk here).
    loss = jax.block_until_ready(barlow_twins_loss(x1, x2))
    assert jnp.allclose(loss, ref, rtol=1e-4, atol=1e-4), (loss, ref)

    # Forced small tile: exercises the multi-chunk accumulation and the
    # core-parallel split path (8 chunks, 2 splits).
    loss_tiled = jax.block_until_ready(barlow_twins_loss(x1, x2, feature_tile=128))
    assert jnp.allclose(loss_tiled, ref, rtol=1e-4, atol=1e-4), (loss_tiled, ref)

    print("KERNEL_OK")
</pallas_src>

<mosaic_0001>
module attributes {stable_mosaic.version = 11 : i64} {
  func.func @_barlow_twins_kernel(%arg0: i32, %arg1: i32, %arg2: memref<8x1024xf32, #tpu.memory_space<vmem>>, %arg3: memref<8x1024xf32, #tpu.memory_space<vmem>>, %arg4: memref<1x16x16xf32, #tpu.memory_space<vmem>>) attributes {dimension_semantics = [#tpu.dimension_semantics<parallel>, #tpu.dimension_semantics<arbitrary>], iteration_bounds = array<i64: 1, 1>, scalar_prefetch = 0 : i64, scratch_operands = 0 : i64, tpu.core_type = #tpu.core_type<tc>, window_params = [{transform_indices = @transform_0, window_bounds = array<i64: 8, 1024>}, {transform_indices = @transform_1, window_bounds = array<i64: 8, 1024>}, {transform_indices = @transform_2, window_bounds = array<i64: 1, 16, 16>}]} {
    %c0_i32 = arith.constant 0 : i32
    %0 = arith.cmpi eq, %arg1, %c0_i32 : i32
    %1 = arith.extui %0 : i1 to i32
    %c0_i32_0 = arith.constant 0 : i32
    %2 = arith.cmpi ne, %1, %c0_i32_0 : i32
    scf.if %2 {
      %cst_16 = arith.constant 0.000000e+00 : f32
      %25 = vector.broadcast %cst_16 : f32 to vector<1x16x16xf32>
      %c0_17 = arith.constant 0 : index
      %c0_18 = arith.constant 0 : index
      %c0_19 = arith.constant 0 : index
      %26 = vector.load %arg4[%c0_17, %c0_18, %c0_19] : memref<1x16x16xf32, #tpu.memory_space<vmem>>, vector<1x16x16xf32>
      tpu.vector_store %arg4[%c0_17, %c0_18, %c0_19], %25 {strides = array<i32>} : memref<1x16x16xf32, #tpu.memory_space<vmem>>, vector<1x16x16xf32>,
    } else {
    }
    %c0 = arith.constant 0 : index
    %c0_1 = arith.constant 0 : index
    %3 = vector.load %arg2[%c0, %c0_1] : memref<8x1024xf32, #tpu.memory_space<vmem>>, vector<8x1024xf32>
    %c0_2 = arith.constant 0 : index
    %c0_3 = arith.constant 0 : index
    %4 = vector.load %arg3[%c0_2, %c0_3] : memref<8x1024xf32, #tpu.memory_space<vmem>>, vector<8x1024xf32>
    %cst = arith.constant 1.250000e-01 : f32
    %5 = vector.broadcast %cst : f32 to vector<8x8xf32>
    %cst_4 = arith.constant 0.142857149 : f32
    %6 = vector.broadcast %cst_4 : f32 to vector<8x8xf32>
    %cst_5 = arith.constant dense<0.000000e+00> : vector<8x1024xf32>
    %7 = tpu.matmul %5, %3, %cst_5 {dimension_numbers = #tpu.dot_dimension_numbers<[1], [0], [0], [1], [0, 0, 1, 1], [], []>} : vector<8x8xf32>, vector<8x1024xf32>, vector<8x1024xf32> -> vector<8x1024xf32>
    %8 = arith.subf %3, %7 : vector<8x1024xf32>
    %9 = arith.mulf %8, %8 : vector<8x1024xf32>
    %cst_6 = arith.constant dense<0.000000e+00> : vector<8x1024xf32>
    %10 = tpu.matmul %6, %9, %cst_6 {dimension_numbers = #tpu.dot_dimension_numbers<[1], [0], [0], [1], [0, 0, 1, 1], [], []>} : vector<8x8xf32>, vector<8x1024xf32>, vector<8x1024xf32> -> vector<8x1024xf32>
    %11 = math.rsqrt %10 : vector<8x1024xf32>
    %12 = arith.mulf %8, %11 : vector<8x1024xf32>
    %cst_7 = arith.constant dense<0.000000e+00> : vector<8x1024xf32>
    %13 = tpu.matmul %5, %4, %cst_7 {dimension_numbers = #tpu.dot_dimension_numbers<[1], [0], [0], [1], [0, 0, 1, 1], [], []>} : vector<8x8xf32>, vector<8x1024xf32>, vector<8x1024xf32> -> vector<8x1024xf32>
    %14 = arith.subf %4, %13 : vector<8x1024xf32>
    %15 = arith.mulf %14, %14 : vector<8x1024xf32>
    %cst_8 = arith.constant dense<0.000000e+00> : vector<8x1024xf32>
    %16 = tpu.matmul %6, %15, %cst_8 {dimension_numbers = #tpu.dot_dimension_numbers<[1], [0], [0], [1], [0, 0, 1, 1], [], []>} : vector<8x8xf32>, vector<8x1024xf32>, vector<8x1024xf32> -> vector<8x1024xf32>
    %17 = math.rsqrt %16 : vector<8x1024xf32>
    %18 = arith.mulf %14, %17 : vector<8x1024xf32>
    %19 = tpu.concatenate %12, %18 in 0 : vector<8x1024xf32>, vector<8x1024xf32> -> vector<16x1024xf32>
    %cst_9 = arith.constant dense<0.000000e+00> : vector<16x16xf32>
    %20 = tpu.matmul %19, %19, %cst_9 {dimension_numbers = #tpu.dot_dimension_numbers<[1], [1], [0], [0], [0, 0, 1, 0], [], []>} : vector<16x1024xf32>, vector<16x1024xf32>, vector<16x16xf32> -> vector<16x16xf32>
    %c0_10 = arith.constant 0 : index
    %c0_11 = arith.constant 0 : index
    %c0_12 = arith.constant 0 : index
    %21 = vector.load %arg4[%c0_10, %c0_11, %c0_12] : memref<1x16x16xf32, #tpu.memory_space<vmem>>, vector<1x16x16xf32>
    %22 = vector.shape_cast %20 : vector<16x16xf32> to vector<1x16x16xf32>
    %23 = arith.addf %21, %22 : vector<1x16x16xf32>
    %c0_13 = arith.constant 0 : index
    %c0_14 = arith.constant 0 : index
    %c0_15 = arith.constant 0 : index
    %24 = vector.load %arg4[%c0_13, %c0_14, %c0_15] : memref<1x16x16xf32, #tpu.memory_space<vmem>>, vector<1x16x16xf32>
    tpu.vector_store %arg4[%c0_13, %c0_14, %c0_15], %23 {strides = array<i32>} : memref<1x16x16xf32, #tpu.memory_space<vmem>>, vector<1x16x16xf32>,
    return
  }
  func.func @transform_0(%arg0: i32, %arg1: i32) -> (i32, i32) {
    %c1_i32 = arith.constant 1 : i32
    %0 = arith.muli %arg0, %c1_i32 : i32
    %1 = arith.addi %0, %arg1 : i32
    %c0_i32 = arith.constant 0 : i32
    %c0_i32_0 = arith.constant 0 : i32
    return %c0_i32, %1 : i32, i32
  }
  func.func @transform_1(%arg0: i32, %arg1: i32) -> (i32, i32) {
    %c1_i32 = arith.constant 1 : i32
    %0 = arith.muli %arg0, %c1_i32 : i32
    %1 = arith.addi %0, %arg1 : i32
    %c0_i32 = arith.constant 0 : i32
    %c0_i32_0 = arith.constant 0 : i32
    return %c0_i32, %1 : i32, i32
  }
  func.func @transform_2(%arg0: i32, %arg1: i32) -> (i32, i32, i32) {
    %c0_i32 = arith.constant 0 : i32
    %c0_i32_0 = arith.constant 0 : i32
    %c0_i32_1 = arith.constant 0 : i32
    return %arg0, %c0_i32, %c0_i32_0 : i32, i32, i32
  }
}

</mosaic_0001>

<bundles_post_ra>
// kernel: tpu_custom_call.1
= control target key start
LH: loop header
LB: loop body
LE: loop exit
PB: predicated region body
PF: predicated region fallthrough
CT: control target
= control target key end

     0   :  { %7 = vsyncpa [#allocation3], 0  ;;  %s1903_s0 = inlined_call_operand.hbm [shape: f32[8,1024], index: 0, kind: input, shape index: {}]   ;;  %s1904_s1 = inlined_call_operand.hbm [shape: f32[8,1024], index: 1, kind: input, shape index: {}]   ;;  %s1905_s2 = inlined_call_operand.hbm [shape: f32[1,16,16], index: 2, kind: output, shape index: {}]  }
   0x1   :  { %8 = vsyncpa [#allocation6], 0 }
   0x2   :  { %9 = vsyncpa [#allocation4], 0  ;;  %s1725_s9 = smov [#allocation2]   ;;  %s1726_s11 = smov [#allocation5]  }
   0x3   :  { %s20_s10 = sshll.u32 %s1725_s9, 4  ;;  %s34_s12 = sshll.u32 %s1726_s11, 4  ;;  %s21_s10 = int_to_ptr.vmem [resolvable:$true] %s20_s10  ;;  %s35_s12 = int_to_ptr.vmem [resolvable:$true] %s34_s12 }
   0x4   :  { %s1667_s13 = scalar_lea.vmem %s21_s10, 1024  ;;  %p1672_p1 = scmp.lt.s32.totalorder %s21_s10, %s21_s10 }
   0x5   :  { %p1668_p0 = scmp.ne.s32.totalorder %s21_s10, %s1667_s13  ;;  %p1673_p2 = scmp.lt.s32.totalorder %s1667_s13, %s1667_s13 }
   0x7   :  { %p1674_p3 = por %p1673_p2, %p1672_p1 }
   0x9   :  { %p1675_p4 = pnand %p1674_p3, %p1668_p0 }
   0xb   :  { %1678 = shalt.err (!%p1675_p4)
}
   0xc   :  { %23 = dma.hbm_to_vmem [thread:$0]  %s1903_s0, 1024, %s21_s10, [#allocation3]  }
   0xd   :  { %s1687_s16 = scalar_lea.vmem %s35_s12, 1024  ;;  %p1692_p6 = scmp.lt.s32.totalorder %s35_s12, %s35_s12 }
   0xe   :  { %p1688_p5 = scmp.ne.s32.totalorder %s35_s12, %s1687_s16  ;;  %p1693_p7 = scmp.lt.s32.totalorder %s1687_s16, %s1687_s16 }
  0x10   :  { %p1694_p8 = por %p1693_p7, %p1692_p6 }
  0x12   :  { %p1695_p9 = pnand %p1694_p8, %p1688_p5 }
  0x14   :  { %1698 = shalt.err (!%p1695_p9)
}
  0x15   :  { %37 = dma.hbm_to_vmem [thread:$0]  %s1904_s1, 1024, %s35_s12, [#allocation6]  }
  0x16   :  { %1719 = dma.done.wait [#allocation3], 1024  }
  0x17   :  { %1720 = vsyncadd [#allocation3], 4294966272 }
  0x18   :  { %1721 = dma.done.wait [#allocation6], 1024  }
  0x19   :  { %1722 = vsyncadd [#allocation6], 4294966272  ;;  %v1727_v0 = vmov 0.0   ;;  %v56_v1 = vld [vmem:[#allocation2 + $0x8] sm:$0xff]  ;;  %v58_v2 = vld [vmem:[#allocation2 + $0x18] sm:$0xff]  ;;  %vm71_vm0 = vcmask 64512  }
  0x1a   :  { %139 = vmatprep.mubr.f32.mxu0 %v1727_v0  ;;  %210 = vmatprep.mubr.f32.mxu1 %v1727_v0  ;;  %v55_v3 = vld [vmem:[#allocation2] sm:$0xff]  ;;  %v57_v4 = vld [vmem:[#allocation2 + $0x10] sm:$0xff]  ;;  %v60_v5 = vld [vmem:[#allocation2 + $0x28] sm:$0xff]  ;;  %v1728_v8 = vmov 0.125   ;;  %v1729_v33 = vmov 0.14285715  }
  0x1b   :  { %105 = vmatprep.subr.mxu0 %v56_v1  ;;  %176 = vmatprep.subr.mxu1 %v58_v2  ;;  %v62_v6 = vld [vmem:[#allocation2 + $0x38] sm:$0xff]  ;;  %v59_v7 = vld [vmem:[#allocation2 + $0x20] sm:$0xff]  ;;  %v61_v9 = vld [vmem:[#allocation2 + $0x30] sm:$0xff]  ;;  %vm52_vm1 = vcmask 130048   ;;  %s1730_s0 = smov [#allocation7]  }
  0x1c   :  { %106 = vmatpush1.msra.mxu0 %v55_v3  ;;  %177 = vmatpush1.msra.mxu1 %v57_v4  ;;  %v64_v35 = vld [vmem:[#allocation5 + $0x8] sm:$0xff]  ;;  %v66_v36 = vld [vmem:[#allocation5 + $0x18] sm:$0xff]  ;;  %v63_v37 = vld [vmem:[#allocation5] sm:$0xff]  ;;  %53 = vst.msk [vmem:[#allocation7] sm:$0xff] %vm52_vm1, %v1727_v0  ;;  %s1590_s1 = sshll.u32 %s1730_s0, 4  ;;  %s1591_s1 = int_to_ptr.vmem [resolvable:$true] %s1590_s1 }
  0x1d   :  { %1603 = vmatmul.mubr.msk.f32.vlgmr.msra.gmra.mxu0 %vm71_vm0, %v1728_v8  ;;  %1604 = vmatmul.mubr.msk.f32.vlgmr.msra.gmra.mxu1 %vm71_vm0, %v1728_v8  ;;  %v65_v38 = vld [vmem:[#allocation5 + $0x10] sm:$0xff]  ;;  %v68_v39 = vld [vmem:[#allocation5 + $0x28] sm:$0xff]  ;;  %v70_v40 = vld [vmem:[#allocation5 + $0x38] sm:$0xff]  ;;  %54 = vst.msk [vmem:[#allocation7 + $0x8] sm:$0xff] %vm52_vm1, %v1727_v0  ;;  %s1699_s19 = scalar_lea.vmem %s1591_s1, 256  ;;  %p1704_p11 = scmp.lt.s32.totalorder %s1591_s1, %s1591_s1 }
  0x1e   :  { %247 = vmatprep.subr.mxu0 %v60_v5  ;;  %318 = vmatprep.subr.mxu1 %v62_v6  ;;  %v67_v41 = vld [vmem:[#allocation5 + $0x20] sm:$0xff]  ;;  %v69_v42 = vld [vmem:[#allocation5 + $0x30] sm:$0xff]  ;;  %p1700_p10 = scmp.ne.s32.totalorder %s1591_s1, %s1699_s19  ;;  %p1705_p12 = scmp.lt.s32.totalorder %s1699_s19, %s1699_s19 }
  0x1f   :  { %248 = vmatpush1.msra.mxu0 %v59_v7  ;;  %281 = vmatprep.mubr.f32.mxu0 %v1727_v0 }
  0x20   :  { %319 = vmatpush1.msra.mxu1 %v61_v9  ;;  %352 = vmatprep.mubr.f32.mxu1 %v1727_v0  ;;  %p1706_p13 = por %p1705_p12, %p1704_p11 }
  0x21   :  { %1605 = vmatmul.mubr.msk.f32.vlgmr.msra.gmra.mxu0 %vm71_vm0, %v1728_v8  ;;  %1606 = vmatmul.mubr.msk.f32.vlgmr.msra.gmra.mxu1 %vm71_vm0, %v1728_v8 }
  0x22   :  { %442 = vmatprep.mubr.f32.mxu0 %v1727_v0  ;;  %513 = vmatprep.mubr.f32.mxu1 %v1727_v0  ;;  %p1707_p0 = pnand %p1706_p13, %p1700_p10 }
  0xdd   :  { %v141_v10 = vpop.f32.mrf.mxu0  ;;  %v212_v11 = vpop.f32.mrf.mxu1 }
  0xde   :  { %v1768_v12 = vsub.f32 %v57_v4, %v212_v11  ;;  %v1770_v13 = vsub.f32 %v55_v3, %v141_v10 }
  0xdf   :  { %v143_v14 = vpop.f32.mrf.mxu0  ;;  %v214_v15 = vpop.f32.mrf.mxu1 }
  0xe0   :  { %v1772_v16 = vsub.f32 %v56_v1, %v143_v14  ;;  %v1774_v17 = vsub.f32 %v58_v2, %v214_v15  ;;  %v369_v20 = vmul.f32 %v1768_v12, %v1768_v12  ;;  %v367_v24 = vmul.f32 %v1770_v13, %v1770_v13 }
  0xe1   :  { %v283_v18 = vpop.f32.mrf.mxu0  ;;  %v354_v19 = vpop.f32.mrf.mxu1 }
  0xe2   :  { %v368_v21 = vmul.f32 %v1772_v16, %v1772_v16  ;;  %v370_v22 = vmul.f32 %v1774_v17, %v1774_v17  ;;  %v1782_v23 = vsub.f32 %v61_v9, %v354_v19  ;;  %v1786_v25 = vsub.f32 %v59_v7, %v283_v18 }
  0xe3   :  { %v285_v26 = vpop.f32.mrf.mxu0  ;;  %v356_v27 = vpop.f32.mrf.mxu1 }
  0xe4   :  { %v1788_v28 = vsub.f32 %v60_v5, %v285_v26  ;;  %v1790_v29 = vsub.f32 %v62_v6, %v356_v27  ;;  %408 = vmatprep.subr.mxu0 %v368_v21  ;;  %v373_v30 = vmul.f32 %v1782_v23, %v1782_v23  ;;  %479 = vmatprep.subr.mxu1 %v370_v22 }
  0xe5   :  { %409 = vmatpush1.msra.mxu0 %v367_v24  ;;  %480 = vmatpush1.msra.mxu1 %v369_v20  ;;  %v371_v34 = vmul.f32 %v1786_v25, %v1786_v25 }
  0xe6   :  { %v372_v31 = vmul.f32 %v1788_v28, %v1788_v28  ;;  %v374_v32 = vmul.f32 %v1790_v29, %v1790_v29  ;;  %1607 = vmatmul.mubr.msk.f32.vlgmr.msra.gmra.mxu0 %vm71_vm0, %v1729_v33  ;;  %1608 = vmatmul.mubr.msk.f32.vlgmr.msra.gmra.mxu1 %vm71_vm0, %v1729_v33 }
  0xe7   :  { %584 = vmatprep.mubr.f32.mxu0 %v1727_v0  ;;  %655 = vmatprep.mubr.f32.mxu1 %v1727_v0 }
  0xe8   :  { %550 = vmatprep.subr.mxu0 %v372_v31  ;;  %621 = vmatprep.subr.mxu1 %v374_v32 }
  0xe9   :  { %551 = vmatpush1.msra.mxu0 %v371_v34  ;;  %622 = vmatpush1.msra.mxu1 %v373_v30 }
  0xea   :  { %1609 = vmatmul.mubr.msk.f32.vlgmr.msra.gmra.mxu0 %vm71_vm0, %v1729_v33  ;;  %1610 = vmatmul.mubr.msk.f32.vlgmr.msra.gmra.mxu1 %vm71_vm0, %v1729_v33 }
  0xeb   :  { %708 = vmatprep.subr.mxu0 %v64_v35  ;;  %779 = vmatprep.subr.mxu1 %v66_v36 }
  0xec   :  { %709 = vmatpush1.msra.mxu0 %v63_v37  ;;  %742 = vmatprep.mubr.f32.mxu0 %v1727_v0 }
  0xed   :  { %780 = vmatpush1.msra.mxu1 %v65_v38  ;;  %813 = vmatprep.mubr.f32.mxu1 %v1727_v0 }
  0xee   :  { %1611 = vmatmul.mubr.msk.f32.vlgmr.msra.gmra.mxu0 %vm71_vm0, %v1728_v8  ;;  %1612 = vmatmul.mubr.msk.f32.vlgmr.msra.gmra.mxu1 %vm71_vm0, %v1728_v8 }
  0xef   :  { %850 = vmatprep.subr.mxu0 %v68_v39  ;;  %921 = vmatprep.subr.mxu1 %v70_v40 }
  0xf0   :  { %851 = vmatpush1.msra.mxu0 %v67_v41  ;;  %884 = vmatprep.mubr.f32.mxu0 %v1727_v0 }
  0xf1   :  { %922 = vmatpush1.msra.mxu1 %v69_v42  ;;  %955 = vmatprep.mubr.f32.mxu1 %v1727_v0 }
  0xf2   :  { %1613 = vmatmul.mubr.msk.f32.vlgmr.msra.gmra.mxu0 %vm71_vm0, %v1728_v8  ;;  %1614 = vmatmul.mubr.msk.f32.vlgmr.msra.gmra.mxu1 %vm71_vm0, %v1728_v8 }
  0xf3   :  { %1042 = vmatprep.mubr.f32.mxu0 %v1727_v0  ;;  %1113 = vmatprep.mubr.f32.mxu1 %v1727_v0 }
 0x1a6   :  { %v444_v43 = vpop.f32.mrf.mxu0  ;;  %v1824_v44 = vpop.f32.mrf.mxu1 }
 0x1a8   :  { %v446_v45 = vpop.f32.mrf.mxu0  ;;  %v517_v46 = vpop.f32.mrf.mxu1 }
 0x1a9   :  { %1627 = vrsqrt.f32 %v446_v45 }
 0x1aa   :  { %v1826_v47 = vpop.f32.mrf.mxu0  ;;  %1629 = vrsqrt.f32 %v517_v46  ;;  %v1828_v48 = vpop.f32.mrf.mxu1 }
 0x1ac   :  { %v588_v49 = vpop.f32.mrf.mxu0  ;;  %v1830_v50 = vpop.f32.mrf.mxu1 }
 0x1ae   :  { %v744_v51 = vpop.f32.mrf.mxu0  ;;  %v815_v52 = vpop.f32.mrf.mxu1 }
 0x1af   :  { %v1832_v53 = vsub.f32 %v63_v37, %v744_v51  ;;  %v1834_v54 = vsub.f32 %v65_v38, %v815_v52 }
 0x1b0   :  { %v746_v55 = vpop.f32.mrf.mxu0  ;;  %v817_v57 = vpop.f32.mrf.mxu1 }
 0x1b1   :  { %v1836_v56 = vsub.f32 %v64_v35, %v746_v55  ;;  %v1838_v58 = vsub.f32 %v66_v36, %v817_v57  ;;  %v972_v60 = vmul.f32 %v1834_v54, %v1834_v54  ;;  %v970_v1 = vmul.f32 %v1832_v53, %v1832_v53 }
 0x1b2   :  { %v886_v59 = vpop.f32.mrf.mxu0  ;;  %v957_v63 = vpop.f32.mrf.mxu1 }
 0x1b3   :  { %v971_v61 = vmul.f32 %v1836_v56, %v1836_v56  ;;  %v1844_v62 = vsub.f32 %v67_v41, %v886_v59  ;;  %v973_v2 = vmul.f32 %v1838_v58, %v1838_v58  ;;  %v1850_v3 = vsub.f32 %v69_v42, %v957_v63 }
 0x1b4   :  { %v888_v4 = vpop.f32.mrf.mxu0  ;;  %v959_v6 = vpop.f32.mrf.mxu1 }
 0x1b5   :  { %v1852_v5 = vsub.f32 %v68_v39, %v888_v4  ;;  %1008 = vmatprep.subr.mxu0 %v971_v61  ;;  %v974_v7 = vmul.f32 %v1844_v62, %v1844_v62  ;;  %v1856_v8 = vsub.f32 %v70_v40, %v959_v6  ;;  %1079 = vmatprep.subr.mxu1 %v973_v2 }
 0x1b6   :  { %1009 = vmatpush1.msra.mxu0 %v970_v1  ;;  %v1628_v9 = vpop.eup %1627  ;;  %v976_v10 = vmul.f32 %v1850_v3, %v1850_v3  ;;  %1080 = vmatpush1.msra.mxu1 %v972_v60  ;;  %v1578_v1 = vld [vmem:[#allocation7] sm:$0xff] }
 0x1b7   :  { %v975_v11 = vmul.f32 %v1852_v5, %v1852_v5  ;;  %1615 = vmatmul.mubr.msk.f32.vlgmr.msra.gmra.mxu0 %vm71_vm0, %v1729_v33  ;;  %v1630_v14 = vpop.eup %1629  ;;  %v977_v15 = vmul.f32 %v1856_v8, %v1856_v8  ;;  %1616 = vmatmul.mubr.msk.f32.vlgmr.msra.gmra.mxu1 %vm71_vm0, %v1729_v33  ;;  %v671_v18 = vmul.f32 %v1628_v9, %v1772_v16  ;;  %v1579_v9 = vld [vmem:[#allocation7 + $0x8] sm:$0xff] }
 0x1b8   :  { %1184 = vmatprep.mubr.f32.mxu0 %v1727_v0  ;;  %1255 = vmatprep.mubr.f32.mxu1 %v1727_v0  ;;  %v673_v19 = vmul.f32 %v1630_v14, %v1774_v17 }
 0x1b9   :  { %1150 = vmatprep.subr.mxu0 %v975_v11  ;;  %1221 = vmatprep.subr.mxu1 %v977_v15 }
 0x1ba   :  { %1151 = vmatpush1.msra.mxu0 %v974_v7  ;;  %1222 = vmatpush1.msra.mxu1 %v976_v10 }
 0x1bb   :  { %1617 = vmatmul.mubr.msk.f32.vlgmr.msra.gmra.mxu0 %vm71_vm0, %v1729_v33  ;;  %1618 = vmatmul.mubr.msk.f32.vlgmr.msra.gmra.mxu1 %vm71_vm0, %v1729_v33 }
 0x1bc   :  { %1342 = vmatprep.mubr.f32.mxu0 %v671_v18  ;;  %1417 = vmatprep.mubr.f32.mxu1 %v673_v19 }
 0x277   :  { %v1044_v20 = vpop.f32.mrf.mxu0  ;;  %v1115_v21 = vpop.f32.mrf.mxu1 }
 0x278   :  { %1631 = vrsqrt.f32 %v1044_v20 }
 0x279   :  { %1633 = vrsqrt.f32 %v1115_v21  ;;  %v1046_v22 = vpop.f32.mrf.mxu0  ;;  %v1117_v24 = vpop.f32.mrf.mxu1 }
 0x27a   :  { %1635 = vrsqrt.f32 %v1046_v22 }
 0x27b   :  { %1637 = vrsqrt.f32 %v1117_v24  ;;  %v1186_v16 = vpop.f32.mrf.mxu0  ;;  %v1257_v26 = vpop.f32.mrf.mxu1 }
 0x27c   :  { %1639 = vrsqrt.f32 %v444_v43 }
 0x27d   :  { %1641 = vrsqrt.f32 %v1824_v44  ;;  %v1188_v27 = vpop.f32.mrf.mxu0  ;;  %v1259_v17 = vpop.f32.mrf.mxu1 }
 0x27e   :  { %1643 = vrsqrt.f32 %v1188_v27 }
 0x27f   :  { %1645 = vrsqrt.f32 %v1259_v17 }
 0x280   :  { %1647 = vrsqrt.f32 %v588_v49 }
 0x281   :  { %1649 = vrsqrt.f32 %v1186_v16 }
 0x282   :  { %1651 = vrsqrt.f32 %v1257_v26 }
 0x283   :  { %1653 = vrsqrt.f32 %v1830_v50 }
 0x284   :  { %1655 = vrsqrt.f32 %v1826_v47 }
 0x285   :  { %v1632_v30 = vpop.eup %1631  ;;  %1657 = vrsqrt.f32 %v1828_v48 }
 0x286   :  { %v1634_v31 = vpop.eup %1633  ;;  %v1270_v37 = vmul.f32 %v1632_v30, %v1832_v53 }
 0x287   :  { %v1636_v32 = vpop.eup %1635  ;;  %v1272_v39 = vmul.f32 %v1634_v31, %v1834_v54 }
 0x288   :  { %v1638_v33 = vpop.eup %1637  ;;  %v1271_v34 = vmul.f32 %v1636_v32, %v1836_v56 }
 0x289   :  { %v1640_v35 = vpop.eup %1639  ;;  %v1273_v36 = vmul.f32 %v1638_v33, %v1838_v58 }
 0x28a   :  { %v1642_v38 = vpop.eup %1641  ;;  %1306 = vmatprep.subr.mxu0 %v1271_v34  ;;  %v670_v42 = vmul.f32 %v1640_v35, %v1770_v13 }
 0x28b   :  { %v1644_v40 = vpop.eup %1643  ;;  %1381 = vmatprep.subr.mxu1 %v1273_v36  ;;  %1307 = vmatpush1.xpose.msra.mxu0 %v1270_v37  ;;  %v672_v44 = vmul.f32 %v1642_v38, %v1768_v12 }
 0x28c   :  { %v1646_v41 = vpop.eup %1645  ;;  %1382 = vmatpush1.xpose.msra.mxu1 %v1272_v39  ;;  %1308 = vmatprep.subr.mxu0 %v671_v18  ;;  %v1275_v45 = vmul.f32 %v1644_v40, %v1852_v5 }
 0x28d   :  { %1383 = vmatprep.subr.mxu1 %v673_v19  ;;  %v1648_v43 = vpop.eup %1647  ;;  %v1277_v47 = vmul.f32 %v1646_v41, %v1856_v8 }
 0x28e   :  { %v1650_v46 = vpop.eup %1649  ;;  %v675_v12 = vmul.f32 %v1648_v43, %v1788_v28 }
 0x28f   :  { %1309 = vmatpush1.xpose.msra.mxu0 %v670_v42  ;;  %v1652_v48 = vpop.eup %1651  ;;  %v1274_v50 = vmul.f32 %v1650_v46, %v1844_v62 }
 0x290   :  { %1384 = vmatpush1.xpose.msra.mxu1 %v672_v44  ;;  %1456 = vmatprep.subr.mxu0 %v1275_v45  ;;  %v1654_v49 = vpop.eup %1653  ;;  %v1276_v13 = vmul.f32 %v1652_v48, %v1850_v3 }
 0x291   :  { %1531 = vmatprep.subr.mxu1 %v1277_v47  ;;  %v1656_v51 = vpop.eup %1655  ;;  %v677_v53 = vmul.f32 %v1654_v49, %v1790_v29 }
 0x292   :  { %1343 = vmatmul.mubr.f32.vlgmr.msra.gmra.mxu0 %v670_v42  ;;  %v1658_v52 = vpop.eup %1657  ;;  %v674_v54 = vmul.f32 %v1656_v51, %v1786_v25 }
 0x293   :  { %1418 = vmatmul.mubr.f32.vlgmr.msra.gmra.mxu1 %v672_v44  ;;  %1347 = vmatprep.mubr.f32.mxu0 %v1271_v34  ;;  %v676_v55 = vmul.f32 %v1658_v52, %v1782_v23 }
 0x294   :  { %1422 = vmatprep.mubr.f32.mxu1 %v1273_v36  ;;  %1457 = vmatpush1.xpose.msra.mxu0 %v1274_v50 }
 0x295   :  { %1532 = vmatpush1.xpose.msra.mxu1 %v1276_v13  ;;  %1458 = vmatprep.subr.mxu0 %v675_v12 }
 0x296   :  { %1533 = vmatprep.subr.mxu1 %v677_v53  ;;  %1348 = vmatmul.mubr.f32.gmra.mxu0 %v1270_v37 }
 0x297   :  { %1423 = vmatmul.mubr.f32.gmra.mxu1 %v1272_v39  ;;  %1492 = vmatprep.mubr.f32.mxu0 %v675_v12 }
 0x298   :  { %1459 = vmatpush1.xpose.msra.mxu0 %v674_v54  ;;  %1567 = vmatprep.mubr.f32.mxu1 %v677_v53 }
 0x299   :  { %1534 = vmatpush1.xpose.msra.mxu1 %v676_v55 }
 0x29b   :  { %1493 = vmatmul.mubr.f32.vlgmr.msra.gmra.mxu0 %v674_v54 }
 0x29c   :  { %1568 = vmatmul.mubr.f32.vlgmr.msra.gmra.mxu1 %v676_v55  ;;  %1497 = vmatprep.mubr.f32.mxu0 %v1275_v45 }
 0x29d   :  { %1572 = vmatprep.mubr.f32.mxu1 %v1277_v47 }
 0x29f   :  { %1498 = vmatmul.mubr.f32.gmra.mxu0 %v1274_v50 }
 0x2a0   :  { %1573 = vmatmul.mubr.f32.gmra.mxu1 %v1276_v13 }
 0x352   :  { %v1344_v25 = vpop.f32.mrf.mxu0 }
 0x353   :  { %v1419_v28 = vpop.f32.mrf.mxu1 }
 0x354   :  { %v1346_v29 = vpop.f32.mrf.mxu0  ;;  %v1420_v60 = vadd.f32 %v1419_v28, %v1344_v25 }
 0x355   :  { %v1421_v23 = vpop.f32.mrf.mxu1 }
 0x356   :  { %v1349_v56 = vpop.f32.mrf.mxu0 }
 0x357   :  { %v1424_v57 = vpop.f32.mrf.mxu1 }
 0x358   :  { %v1351_v58 = vpop.f32.mrf.mxu0  ;;  %v1425_v3 = vadd.f32 %v1424_v57, %v1349_v56 }
 0x359   :  { %v1426_v59 = vpop.f32.mrf.mxu1 }
 0x35b   :  { %v1494_v61 = vpop.f32.mrf.mxu0 }
 0x35c   :  { %v1495_v62 = vadd.f32 %v1494_v61, %v1420_v60  ;;  %v1569_v63 = vpop.f32.mrf.mxu1 }
 0x35d   :  { %v1496_v2 = vpop.f32.mrf.mxu0 }
 0x35e   :  { %v1570_v4 = vadd.f32 %v1569_v63, %v1495_v62  ;;  %v1571_v5 = vpop.f32.mrf.mxu1 }
 0x35f   :  { %v1499_v6 = vpop.f32.mrf.mxu0 }
 0x360   :  { %v1580_v7 = vadd.f32 %v1578_v1, %v1570_v4  ;;  %v1500_v0 = vadd.f32 %v1499_v6, %v1425_v3  ;;  %v1574_v8 = vpop.f32.mrf.mxu1 }
 0x361   :  { %v1501_v10 = vpop.f32.mrf.mxu0 }
 0x362   :  { %1583 = vst.msk [vmem:[#allocation7] sm:$0xff] %vm52_vm1, %v1580_v7  ;;  %v1575_v11 = vadd.f32 %v1574_v8, %v1500_v0  ;;  %v1576_v14 = vpop.f32.mrf.mxu1 }
 0x364   :  { %v1581_v15 = vadd.f32 %v1579_v9, %v1575_v11 }
 0x366   :  { %1584 = vst.msk [vmem:[#allocation7 + $0x8] sm:$0xff] %vm52_vm1, %v1581_v15 }
 0x367   :  { %1710 = shalt.err (!%p1707_p0)
}
 0x368   :  { %s1731_s20 = smov 128   ;;  %s1732_s21 = smov 8  }
 0x369   :  { %1596 = dma.vmem_to_hbm [thread:$0]  %s1591_s1, 256, %s1905_s2, [#allocation4], %s1731_s20, %s1731_s20, %s1732_s21  }
 0x36a   :  { %1723 = dma.done.wait [#allocation4], 256  }
 0x36b   :  { %1724 = vsyncadd [#allocation4], 4294967040 }
 0x36c   :  { %1600 = vsyncpa [#allocation3], 1 }
 0x36d   :  { %1601 = vsyncpa [#allocation6], 1 }
 0x36e   :  { %1602 = vsyncpa [#allocation4], 1 }

</bundles_post_ra>
